<compile_context>
chip_gen: v6e
topology: v6e:2x2x1
jax: 0.10.0
libtpu: 0.0.40
codegen_flags: <defaults>
</compile_context>

<pallas_src>
import functools

import jax
import jax.numpy as jnp
from jax.experimental import pallas as pl
from jax.experimental.pallas import tpu as pltpu

BN_EPS = 1e-5


def _round_up(x, m):
    return (x + m - 1) // m * m


def _pick_tk(kp):
    for cand in (512, 256, 128):
        if kp % cand == 0:
            return cand
    return 128


def _vmem_cap_bytes():
    """Generation-aware usable VMEM budget (with headroom), safe fallback."""
    try:
        phys = int(pltpu.get_tpu_info().vmem_capacity_bytes)
    except Exception:
        phys = 64 << 20  # conservative (v7x physical size)
    return max((phys * 3) // 4, 16 << 20)


# ---------- Pass 1: K-tiled bf16 GEMM + per-tile channel sum / sumsq --------
def matmul_stats_kernel(x_ref, w_ref, y_ref, sum_ref, sq_ref, acc_ref):
    # x_ref: (TM, TK) bf16 | w_ref: (TK, Cp) bf16
    # y_ref: (TM, Cp) bf16 output
    # sum_ref/sq_ref: (8, Cp) f32 per-M-tile partials (row 0 meaningful, rows 1..7 zero)
    # acc_ref: (TM, Cp) f32 VMEM scratch, resident across the K axis
    k = pl.program_id(1)

    @pl.when(k == 0)
    def _():
        acc_ref[...] = jnp.zeros_like(acc_ref)

    acc_ref[...] += jnp.dot(x_ref[...], w_ref[...],
                            preferred_element_type=jnp.float32)

    @pl.when(k == pl.num_programs(1) - 1)
    def _():
        y = acc_ref[...]                              # exact f32 accumulator
        y_ref[...] = y.astype(y_ref.dtype)            # bf16 HBM stream
        # Per-tile channel statistics in f32 (zero pad-rows contribute 0).
        sum_ref[...] = jnp.zeros_like(sum_ref)
        sq_ref[...] = jnp.zeros_like(sq_ref)
        sum_ref[0:1, :] = jnp.sum(y, axis=0, keepdims=True)
        sq_ref[0:1, :] = jnp.sum(y * y, axis=0, keepdims=True)


# ---------- Pass 2: normalize (folded scale/shift) + ReLU -------------------
def bn_relu_kernel(y_ref, scale_ref, shift_ref, o_ref):
    # y_ref: (TM2, Cp) bf16 | scale/shift: (1, Cp) f32 | o_ref: (TM2, Cp) f32
    y = y_ref[...].astype(jnp.float32)
    o_ref[...] = jnp.maximum(y * scale_ref[...] + shift_ref[...], 0.0)


@functools.partial(jax.jit, static_argnames=("stride", "padding", "dilation", "tm"))
def conv2d_layer_forward(x_nchw, weight_oihw, gamma, beta,
                         stride=1, padding=1, dilation=1, tm=256):
    """Forward of Conv2dLayer. x_nchw: (N, Cin, H, W), weight: (Cout, Cin, KH, KW)."""
    n, cin, h, w = x_nchw.shape
    cout, _, kh, kw = weight_oihw.shape

    # ---- glue: layout change + ReplicationPad2d + im2col (bf16, fused by this jit) ----
    x_nhwc = jnp.transpose(x_nchw, (0, 2, 3, 1)).astype(jnp.bfloat16)
    x_pad = jnp.pad(x_nhwc,
                    ((0, 0), (padding, padding), (padding, padding), (0, 0)),
                    mode="edge")
    hp, wp = h + 2 * padding, w + 2 * padding
    oh = (hp - dilation * (kh - 1) - 1) // stride + 1
    ow = (wp - dilation * (kw - 1) - 1) // stride + 1

    patches = []
    for i in range(kh):
        for j in range(kw):
            patches.append(
                x_pad[:,
                      i * dilation: i * dilation + (oh - 1) * stride + 1: stride,
                      j * dilation: j * dilation + (ow - 1) * stride + 1: stride,
                      :])
    patches = jnp.concatenate(patches, axis=-1)  # (N, OH, OW, KH*KW*Cin) bf16

    m = n * oh * ow
    k = kh * kw * cin

    # ---- TPU-friendly padded GEMM shapes & tile selection -----------------
    kp = _round_up(k, 128)                 # K padded to lane/sublane multiple
    cp = _round_up(cout, 128)              # lane-dense output channels
    tk = _pick_tk(kp)                      # streamed K tile
    grid_k = kp // tk

    vmem_cap = _vmem_cap_bytes()

    tm = max(16, min(tm, _round_up(m, 16)))     # bf16 sublane packing => mult of 16

    def _pass1_need(tm_):
        # double-buffered X/W/Y tiles + f32 accumulator + tiny stats blocks
        return (2 * tm_ * tk * 2 + 2 * tk * cp * 2 + 2 * tm_ * cp * 2
                + tm_ * cp * 4 + 4 * 8 * cp * 4)

    while 2 * _pass1_need(tm) > vmem_cap and tm > 16:
        tm = max(16, (tm // 2) // 16 * 16)

    mp = _round_up(m, tm)
    grid_m = mp // tm

    # Pass 2 has no W / K resident: give it a bigger row tile that divides Mp.
    tm2 = tm
    for f in (8, 4, 2):
        cand = tm * f
        need2 = 2 * cand * cp * 2 + 2 * cand * cp * 4 + 4 * cp * 4
        if grid_m % f == 0 and cand <= 2048 and 2 * need2 <= vmem_cap:
            tm2 = cand
            break
    grid_m2 = mp // tm2

    vmem_limit1 = int(min(max(4 * _pass1_need(tm), 8 << 20), vmem_cap))
    vmem_limit2 = int(min(max(4 * (tm2 * cp * 12 + 4 * cp * 4), 8 << 20), vmem_cap))

    x_gemm = patches.reshape(m, k)
    x_gemm = jnp.pad(x_gemm, ((0, mp - m), (0, kp - k)))           # bf16 already

    # PyTorch weight (Cout, Cin, KH, KW) -> (KH, KW, Cin, Cout) -> (K, Cout), padded.
    w_gemm = jnp.transpose(weight_oihw, (2, 3, 1, 0)).reshape(k, cout)
    w_gemm = jnp.pad(w_gemm, ((0, kp - k), (0, cp - cout))).astype(jnp.bfloat16)

    # ---- pass 1: GEMM (K-tiled) + per-tile stats ---------------------------
    cost1 = pl.CostEstimate(
        flops=2 * mp * kp * cp + 4 * mp * cp,
        transcendentals=0,
        bytes_accessed=mp * kp * 2 + grid_m * kp * cp * 2 + mp * cp * 2
                       + 2 * grid_m * 8 * cp * 4)

    y_gemm, psum, psq = pl.pallas_call(
        matmul_stats_kernel,
        out_shape=(jax.ShapeDtypeStruct((mp, cp), jnp.bfloat16),
                   jax.ShapeDtypeStruct((grid_m * 8, cp), jnp.float32),
                   jax.ShapeDtypeStruct((grid_m * 8, cp), jnp.float32)),
        grid=(grid_m, grid_k),
        in_specs=[
            pl.BlockSpec((tm, tk), lambda i, kk: (i, kk)),
            pl.BlockSpec((tk, cp), lambda i, kk: (kk, 0)),
        ],
        out_specs=(
            pl.BlockSpec((tm, cp), lambda i, kk: (i, 0)),   # resident across K
            pl.BlockSpec((8, cp), lambda i, kk: (i, 0)),    # per-tile partials
            pl.BlockSpec((8, cp), lambda i, kk: (i, 0)),
        ),
        scratch_shapes=[pltpu.VMEM((tm, cp), jnp.float32)],
        compiler_params=pltpu.CompilerParams(
            dimension_semantics=("parallel", "arbitrary"),  # M parallel (v7x megacore)
            vmem_limit_bytes=vmem_limit1),
        cost_estimate=cost1,
    )(x_gemm, w_gemm)

    # ---- tiny XLA segment: reduce partials, fold BN (training, biased var) --
    inv_m = 1.0 / float(m)                      # true row count (pad rows sum to 0)
    y_sum = jnp.sum(psum, axis=0, keepdims=True)            # (1, Cp) f32
    y_sq = jnp.sum(psq, axis=0, keepdims=True)
    mean = y_sum * inv_m
    var = jnp.maximum(y_sq * inv_m - mean * mean, 0.0)
    inv_std = jax.lax.rsqrt(var + BN_EPS)
    gamma_p = jnp.pad(gamma.astype(jnp.float32), (0, cp - cout)).reshape(1, cp)
    beta_p = jnp.pad(beta.astype(jnp.float32), (0, cp - cout)).reshape(1, cp)
    scale = gamma_p * inv_std
    shift = beta_p - mean * scale

    # ---- pass 2: normalize + ReLU (embarrassingly parallel over M) ---------
    cost2 = pl.CostEstimate(
        flops=3 * mp * cp,
        transcendentals=0,
        bytes_accessed=mp * cp * 2 + mp * cp * 4 + 2 * cp * 4)

    out_gemm = pl.pallas_call(
        bn_relu_kernel,
        out_shape=jax.ShapeDtypeStruct((mp, cp), jnp.float32),
        grid=(grid_m2,),
        in_specs=[
            pl.BlockSpec((tm2, cp), lambda i: (i, 0)),
            pl.BlockSpec((1, cp), lambda i: (0, 0)),
            pl.BlockSpec((1, cp), lambda i: (0, 0)),
        ],
        out_specs=pl.BlockSpec((tm2, cp), lambda i: (i, 0)),
        compiler_params=pltpu.CompilerParams(
            dimension_semantics=("parallel",),
            vmem_limit_bytes=vmem_limit2),
        cost_estimate=cost2,
    )(y_gemm, scale, shift)

    # strip padding, back to NCHW (PyTorch output layout)
    out = out_gemm[:m, :cout].reshape(n, oh, ow, cout)
    return jnp.transpose(out, (0, 3, 1, 2))


def _reference_forward(x_nchw, weight_oihw, gamma, beta,
                       stride=1, padding=1, dilation=1,
                       matmul_dtype=jnp.float32):
    """Pure-JAX reference mirroring the PyTorch module (training-mode BN)."""
    x_pad = jnp.pad(x_nchw,
                    ((0, 0), (0, 0), (padding, padding), (padding, padding)),
                    mode="edge")
    y = jax.lax.conv_general_dilated(
        x_pad.astype(matmul_dtype), weight_oihw.astype(matmul_dtype),
        window_strides=(stride, stride), padding="VALID",
        rhs_dilation=(dilation, dilation),
        dimension_numbers=("NCHW", "OIHW", "NCHW"),
        preferred_element_type=jnp.float32)
    mean = jnp.mean(y, axis=(0, 2, 3), keepdims=True)
    var = jnp.mean((y - mean) ** 2, axis=(0, 2, 3), keepdims=True)
    y = (y - mean) * jax.lax.rsqrt(var + BN_EPS)
    y = y * gamma.reshape(1, -1, 1, 1) + beta.reshape(1, -1, 1, 1)
    return jnp.maximum(y, 0.0)


if __name__ == "__main__":
    # Conv2dLayer(in_channels=4, out_channels=8, kernel_size=3, stride=1,
    #             padding=1, dilation=1)  (bias=False)
    N, Cin, H, W = 2, 4, 16, 16
    Cout, KH, KW = 8, 3, 3
    stride, padding, dilation = 1, 1, 1

    key = jax.random.PRNGKey(0)
    kx, kw_ = jax.random.split(key)
    x = jax.random.normal(kx, (N, Cin, H, W), dtype=jnp.float32)
    weight = jax.random.normal(kw_, (Cout, Cin, KH, KW), dtype=jnp.float32) * 0.1
    # BatchNorm2d default affine init: weight=1, bias=0
    gamma = jnp.ones((Cout,), dtype=jnp.float32)
    beta = jnp.zeros((Cout,), dtype=jnp.float32)

    out = conv2d_layer_forward(x, weight, gamma, beta,
                               stride=stride, padding=padding, dilation=dilation)
    out = jax.block_until_ready(out)
    assert out.shape == (N, Cout, H, W), out.shape

    # Check vs a reference using the same bf16 MXU operand precision (the only
    # extra kernel rounding is the bf16 Y intermediate stream).
    ref_bf16 = _reference_forward(x, weight, gamma, beta, stride, padding, dilation,
                                  matmul_dtype=jnp.bfloat16)
    assert jnp.allclose(out, ref_bf16, atol=2.5e-2, rtol=2.5e-2), \
        float(jnp.max(jnp.abs(out - ref_bf16)))

    # Loose check vs exact f32 PyTorch semantics (difference: bf16 rounding of
    # the matmul operands and of the Y stream; accumulation/BN/ReLU are f32).
    ref_f32 = _reference_forward(x, weight, gamma, beta, stride, padding, dilation,
                                 matmul_dtype=jnp.float32)
    assert jnp.allclose(out, ref_f32, atol=7e-2, rtol=7e-2), \
        float(jnp.max(jnp.abs(out - ref_f32)))

    print("KERNEL_OK")
</pallas_src>

<mosaic_0001>
module attributes {stable_mosaic.version = 11 : i64} {
  func.func @matmul_stats_kernel(%arg0: i32, %arg1: i32, %arg2: memref<256x128xbf16, #tpu.memory_space<vmem>>, %arg3: memref<128x128xbf16, #tpu.memory_space<vmem>>, %arg4: memref<256x128xbf16, #tpu.memory_space<vmem>>, %arg5: memref<8x128xf32, #tpu.memory_space<vmem>>, %arg6: memref<8x128xf32, #tpu.memory_space<vmem>>, %arg7: memref<256x128xf32, #tpu.memory_space<vmem>>) attributes {dimension_semantics = [#tpu.dimension_semantics<parallel>, #tpu.dimension_semantics<arbitrary>], iteration_bounds = array<i64: 2, 1>, scalar_prefetch = 0 : i64, scratch_operands = 1 : i64, tpu.core_type = #tpu.core_type<tc>, window_params = [{transform_indices = @transform_0, window_bounds = array<i64: 256, 128>}, {transform_indices = @transform_1, window_bounds = array<i64: 128, 128>}, {transform_indices = @transform_2, window_bounds = array<i64: 256, 128>}, {transform_indices = @transform_3, window_bounds = array<i64: 8, 128>}, {transform_indices = @transform_4, window_bounds = array<i64: 8, 128>}]} {
    %c0_i32 = arith.constant 0 : i32
    %0 = arith.cmpi eq, %arg1, %c0_i32 : i32
    %1 = arith.extui %0 : i1 to i32
    %c0_i32_0 = arith.constant 0 : i32
    %2 = arith.cmpi ne, %1, %c0_i32_0 : i32
    scf.if %2 {
      %cst_10 = arith.constant 0.000000e+00 : f32
      %12 = vector.broadcast %cst_10 : f32 to vector<256x128xf32>
      %c0_11 = arith.constant 0 : index
      %c0_12 = arith.constant 0 : index
      %13 = vector.load %arg7[%c0_11, %c0_12] : memref<256x128xf32, #tpu.memory_space<vmem>>, vector<256x128xf32>
      tpu.vector_store %arg7[%c0_11, %c0_12], %12 {strides = array<i32>} : memref<256x128xf32, #tpu.memory_space<vmem>>, vector<256x128xf32>,
    } else {
    }
    %c0 = arith.constant 0 : index
    %c0_1 = arith.constant 0 : index
    %3 = vector.load %arg7[%c0, %c0_1] : memref<256x128xf32, #tpu.memory_space<vmem>>, vector<256x128xf32>
    %c0_2 = arith.constant 0 : index
    %c0_3 = arith.constant 0 : index
    %4 = vector.load %arg2[%c0_2, %c0_3] : memref<256x128xbf16, #tpu.memory_space<vmem>>, vector<256x128xbf16>
    %c0_4 = arith.constant 0 : index
    %c0_5 = arith.constant 0 : index
    %5 = vector.load %arg3[%c0_4, %c0_5] : memref<128x128xbf16, #tpu.memory_space<vmem>>, vector<128x128xbf16>
    %cst = arith.constant dense<0.000000e+00> : vector<256x128xf32>
    %6 = tpu.matmul %4, %5, %cst {dimension_numbers = #tpu.dot_dimension_numbers<[1], [0], [0], [1], [0, 0, 1, 1], [], []>} : vector<256x128xbf16>, vector<128x128xbf16>, vector<256x128xf32> -> vector<256x128xf32>
    %7 = arith.addf %3, %6 : vector<256x128xf32>
    %c0_6 = arith.constant 0 : index
    %c0_7 = arith.constant 0 : index
    %8 = vector.load %arg7[%c0_6, %c0_7] : memref<256x128xf32, #tpu.memory_space<vmem>>, vector<256x128xf32>
    tpu.vector_store %arg7[%c0_6, %c0_7], %7 {strides = array<i32>} : memref<256x128xf32, #tpu.memory_space<vmem>>, vector<256x128xf32>,
    %c0_i32_8 = arith.constant 0 : i32
    %9 = arith.cmpi eq, %arg1, %c0_i32_8 : i32
    %10 = arith.extui %9 : i1 to i32
    %c0_i32_9 = arith.constant 0 : i32
    %11 = arith.cmpi ne, %10, %c0_i32_9 : i32
    scf.if %11 {
      %c0_10 = arith.constant 0 : index
      %c0_11 = arith.constant 0 : index
      %12 = vector.load %arg7[%c0_10, %c0_11] : memref<256x128xf32, #tpu.memory_space<vmem>>, vector<256x128xf32>
      %13 = arith.truncf %12 : vector<256x128xf32> to vector<256x128xbf16>
      %c0_12 = arith.constant 0 : index
      %c0_13 = arith.constant 0 : index
      %14 = vector.load %arg4[%c0_12, %c0_13] : memref<256x128xbf16, #tpu.memory_space<vmem>>, vector<256x128xbf16>
      tpu.vector_store %arg4[%c0_12, %c0_13], %13 {strides = array<i32>} : memref<256x128xbf16, #tpu.memory_space<vmem>>, vector<256x128xbf16>,
      %cst_14 = arith.constant 0.000000e+00 : f32
      %15 = vector.broadcast %cst_14 : f32 to vector<8x128xf32>
      %c0_15 = arith.constant 0 : index
      %c0_16 = arith.constant 0 : index
      %16 = vector.load %arg5[%c0_15, %c0_16] : memref<8x128xf32, #tpu.memory_space<vmem>>, vector<8x128xf32>
      tpu.vector_store %arg5[%c0_15, %c0_16], %15 {strides = array<i32>} : memref<8x128xf32, #tpu.memory_space<vmem>>, vector<8x128xf32>,
      %cst_17 = arith.constant 0.000000e+00 : f32
      %17 = vector.broadcast %cst_17 : f32 to vector<8x128xf32>
      %c0_18 = arith.constant 0 : index
      %c0_19 = arith.constant 0 : index
      %18 = vector.load %arg6[%c0_18, %c0_19] : memref<8x128xf32, #tpu.memory_space<vmem>>, vector<8x128xf32>
      tpu.vector_store %arg6[%c0_18, %c0_19], %17 {strides = array<i32>} : memref<8x128xf32, #tpu.memory_space<vmem>>, vector<8x128xf32>,
      %cst_20 = arith.constant dense<0.000000e+00> : vector<128xf32>
      %19 = vector.multi_reduction <add>, %12, %cst_20 [0] : vector<256x128xf32> to vector<128xf32>
      %20 = vector.shape_cast %19 : vector<128xf32> to vector<1x128xf32>
      %c0_21 = arith.constant 0 : index
      %c0_22 = arith.constant 0 : index
      %21 = vector.load %arg5[%c0_21, %c0_22] : memref<8x128xf32, #tpu.memory_space<vmem>>, vector<1x128xf32>
      tpu.vector_store %arg5[%c0_21, %c0_22], %20 {strides = array<i32>} : memref<8x128xf32, #tpu.memory_space<vmem>>, vector<1x128xf32>,
      %22 = arith.mulf %12, %12 : vector<256x128xf32>
      %cst_23 = arith.constant dense<0.000000e+00> : vector<128xf32>
      %23 = vector.multi_reduction <add>, %22, %cst_23 [0] : vector<256x128xf32> to vector<128xf32>
      %24 = vector.shape_cast %23 : vector<128xf32> to vector<1x128xf32>
      %c0_24 = arith.constant 0 : index
      %c0_25 = arith.constant 0 : index
      %25 = vector.load %arg6[%c0_24, %c0_25] : memref<8x128xf32, #tpu.memory_space<vmem>>, vector<1x128xf32>
      tpu.vector_store %arg6[%c0_24, %c0_25], %24 {strides = array<i32>} : memref<8x128xf32, #tpu.memory_space<vmem>>, vector<1x128xf32>,
    } else {
    }
    return
  }
  func.func @transform_0(%arg0: i32, %arg1: i32) -> (i32, i32) {
    %c0_i32 = arith.constant 0 : i32
    return %arg0, %arg1 : i32, i32
  }
  func.func @transform_1(%arg0: i32, %arg1: i32) -> (i32, i32) {
    %c0_i32 = arith.constant 0 : i32
    %c0_i32_0 = arith.constant 0 : i32
    return %arg1, %c0_i32 : i32, i32
  }
  func.func @transform_2(%arg0: i32, %arg1: i32) -> (i32, i32) {
    %c0_i32 = arith.constant 0 : i32
    %c0_i32_0 = arith.constant 0 : i32
    return %arg0, %c0_i32 : i32, i32
  }
  func.func @transform_3(%arg0: i32, %arg1: i32) -> (i32, i32) {
    %c0_i32 = arith.constant 0 : i32
    %c0_i32_0 = arith.constant 0 : i32
    return %arg0, %c0_i32 : i32, i32
  }
  func.func @transform_4(%arg0: i32, %arg1: i32) -> (i32, i32) {
    %c0_i32 = arith.constant 0 : i32
    %c0_i32_0 = arith.constant 0 : i32
    return %arg0, %c0_i32 : i32, i32
  }
}

module attributes {stable_mosaic.version = 11 : i64} {
  func.func @bn_relu_kernel(%arg0: i32, %arg1: memref<512x128xbf16, #tpu.memory_space<vmem>>, %arg2: memref<1x128xf32, #tpu.memory_space<vmem>>, %arg3: memref<1x128xf32, #tpu.memory_space<vmem>>, %arg4: memref<512x128xf32, #tpu.memory_space<vmem>>) attributes {dimension_semantics = [#tpu.dimension_semantics<parallel>], iteration_bounds = array<i64: 1>, scalar_prefetch = 0 : i64, scratch_operands = 0 : i64, tpu.core_type = #tpu.core_type<tc>, window_params = [{transform_indices = @transform_0, window_bounds = array<i64: 512, 128>}, {pipeline_mode = #tpu.pipeline_mode<synchronous>, transform_indices = @transform_1, window_bounds = array<i64: 1, 128>}, {pipeline_mode = #tpu.pipeline_mode<synchronous>, transform_indices = @transform_2, window_bounds = array<i64: 1, 128>}, {transform_indices = @transform_3, window_bounds = array<i64: 512, 128>}]} {
    %c0 = arith.constant 0 : index
    %c0_0 = arith.constant 0 : index
    %0 = vector.load %arg1[%c0, %c0_0] : memref<512x128xbf16, #tpu.memory_space<vmem>>, vector<512x128xbf16>
    %1 = arith.extf %0 : vector<512x128xbf16> to vector<512x128xf32>
    %c0_1 = arith.constant 0 : index
    %c0_2 = arith.constant 0 : index
    %2 = vector.load %arg2[%c0_1, %c0_2] : memref<1x128xf32, #tpu.memory_space<vmem>>, vector<1x128xf32>
    %3 = vector.broadcast %2 : vector<1x128xf32> to vector<512x128xf32>
    %4 = arith.mulf %1, %3 : vector<512x128xf32>
    %c0_3 = arith.constant 0 : index
    %c0_4 = arith.constant 0 : index
    %5 = vector.load %arg3[%c0_3, %c0_4] : memref<1x128xf32, #tpu.memory_space<vmem>>, vector<1x128xf32>
    %6 = vector.broadcast %5 : vector<1x128xf32> to vector<512x128xf32>
    %7 = arith.addf %4, %6 : vector<512x128xf32>
    %cst = arith.constant 0.000000e+00 : f32
    %8 = vector.broadcast %cst : f32 to vector<512x128xf32>
    %9 = arith.maximumf %7, %8 : vector<512x128xf32>
    %c0_5 = arith.constant 0 : index
    %c0_6 = arith.constant 0 : index
    %10 = vector.load %arg4[%c0_5, %c0_6] : memref<512x128xf32, #tpu.memory_space<vmem>>, vector<512x128xf32>
    tpu.vector_store %arg4[%c0_5, %c0_6], %9 {strides = array<i32>} : memref<512x128xf32, #tpu.memory_space<vmem>>, vector<512x128xf32>,
    return
  }
  func.func @transform_0(%arg0: i32) -> (i32, i32) {
    %c0_i32 = arith.constant 0 : i32
    %c0_i32_0 = arith.constant 0 : i32
    return %arg0, %c0_i32 : i32, i32
  }
  func.func @transform_1(%arg0: i32) -> (i32, i32) {
    %c0_i32 = arith.constant 0 : i32
    %c0_i32_0 = arith.constant 0 : i32
    %c0_i32_1 = arith.constant 0 : i32
    return %c0_i32, %c0_i32_0 : i32, i32
  }
  func.func @transform_2(%arg0: i32) -> (i32, i32) {
    %c0_i32 = arith.constant 0 : i32
    %c0_i32_0 = arith.constant 0 : i32
    %c0_i32_1 = arith.constant 0 : i32
    return %c0_i32, %c0_i32_0 : i32, i32
  }
  func.func @transform_3(%arg0: i32) -> (i32, i32) {
    %c0_i32 = arith.constant 0 : i32
    %c0_i32_0 = arith.constant 0 : i32
    return %arg0, %c0_i32 : i32, i32
  }
}

</mosaic_0001>

<bundles_post_ra>
// kernel: conv2d_layer_forward.3
= control target key start
LH: loop header
LB: loop body
LE: loop exit
PB: predicated region body
PF: predicated region fallthrough
CT: control target
= control target key end

     0   :  { %s1023_s0 = inlined_call_operand.vmem [shape: bf16[512,128], index: 0, kind: input, shape index: {}]   ;;  %s1024_s1 = inlined_call_operand.vmem [shape: f32[1,128], index: 1, kind: input, shape index: {}]   ;;  %s1025_s2 = inlined_call_operand.vmem [shape: f32[1,128], index: 2, kind: input, shape index: {}]   ;;  %s1026_s3 = inlined_call_operand.vmem [shape: f32[512,128], index: 3, kind: output, shape index: {}]  }
   0x1   :  { %v419_v0 = vld [vmem:[%s1023_s0] sm:$0xff]   ;;  %v546_v4 = vld [vmem:[%s1023_s0 + $0x8] sm:$0xff]   ;;  %v547_v5 = vld [vmem:[%s1023_s0 + $0x10] sm:$0xff]  }
   0x2   :  { %v603_v1 = vld [vmem:[%s1024_s1] ss:$0 sm:$0xff]  ;;  %v420_v2 = vunpack.c.l.bf16 %v419_v0  ;;  %v421_v3 = vunpack.c.h.bf16 %v419_v0  ;;  %v548_v6 = vld [vmem:[%s1023_s0 + $0x18] sm:$0xff]   ;;  %v424_v8 = vunpack.c.l.bf16 %v546_v4  ;;  %v425_v9 = vunpack.c.h.bf16 %v546_v4  ;;  %v550_v33 = vld [vmem:[%s1023_s0 + $0x28] sm:$0xff]  }
   0x3   :  { %v617_v7 = vld [vmem:[%s1025_s2] ss:$0 sm:$0xff]  ;;  %v428_v10 = vunpack.c.l.bf16 %v547_v5  ;;  %v429_v11 = vunpack.c.h.bf16 %v547_v5  ;;  %v432_v14 = vunpack.c.l.bf16 %v548_v6  ;;  %v433_v15 = vunpack.c.h.bf16 %v548_v6  ;;  %v551_v34 = vld [vmem:[%s1023_s0 + $0x30] sm:$0xff]   ;;  %v552_v39 = vld [vmem:[%s1023_s0 + $0x38] sm:$0xff]  }
   0x4   :  { %v149_v12 = vmul.f32 %v420_v2, %v603_v1  ;;  %v150_v13 = vmul.f32 %v421_v3, %v603_v1  ;;  %v151_v16 = vmul.f32 %v424_v8, %v603_v1  ;;  %v152_v17 = vmul.f32 %v425_v9, %v603_v1  ;;  %v549_v28 = vld [vmem:[%s1023_s0 + $0x20] sm:$0xff]   ;;  %v554_v6 = vld [vmem:[%s1023_s0 + $0x48] sm:$0xff]   ;;  %v555_v8 = vld [vmem:[%s1023_s0 + $0x50] sm:$0xff]  }
   0x5   :  { %v153_v18 = vmul.f32 %v428_v10, %v603_v1  ;;  %v154_v19 = vmul.f32 %v429_v11, %v603_v1  ;;  %v155_v22 = vmul.f32 %v432_v14, %v603_v1  ;;  %v156_v23 = vmul.f32 %v433_v15, %v603_v1  ;;  %v553_v0 = vld [vmem:[%s1023_s0 + $0x40] sm:$0xff]  }
   0x6   :  { %v220_v20 = vadd.f32 %v617_v7, %v149_v12  ;;  %v221_v21 = vadd.f32 %v617_v7, %v150_v13  ;;  %v222_v24 = vadd.f32 %v617_v7, %v151_v16  ;;  %v223_v25 = vadd.f32 %v617_v7, %v152_v17  ;;  %v556_v13 = vld [vmem:[%s1023_s0 + $0x58] sm:$0xff]  }
   0x7   :  { %v224_v26 = vadd.f32 %v617_v7, %v153_v18  ;;  %v225_v27 = vadd.f32 %v617_v7, %v154_v19  ;;  %v226_v31 = vadd.f32 %v617_v7, %v155_v22  ;;  %v227_v32 = vadd.f32 %v617_v7, %v156_v23 }
   0x8   :  { %v284_v29 = vmax.f32 %v220_v20, 0.0  ;;  %v285_v30 = vmax.f32 %v221_v21, 0.0  ;;  %v286_v35 = vmax.f32 %v222_v24, 0.0  ;;  %v287_v36 = vmax.f32 %v223_v25, 0.0 }
   0x9   :  { %v288_v37 = vmax.f32 %v224_v26, 0.0  ;;  %v289_v38 = vmax.f32 %v225_v27, 0.0  ;;  %v290_v40 = vmax.f32 %v226_v31, 0.0  ;;  %v291_v41 = vmax.f32 %v227_v32, 0.0 }
   0xa   :  { %348 = vst [vmem:[%s1026_s3] sm:$0xff] %v284_v29  ;;  %349 = vst [vmem:[%s1026_s3 + $0x8] sm:$0xff] %v285_v30  ;;  %v436_v42 = vunpack.c.l.bf16 %v549_v28  ;;  %v437_v43 = vunpack.c.h.bf16 %v549_v28  ;;  %v440_v44 = vunpack.c.l.bf16 %v550_v33  ;;  %v441_v45 = vunpack.c.h.bf16 %v550_v33 }
   0xb   :  { %350 = vst [vmem:[%s1026_s3 + $0x10] sm:$0xff] %v286_v35  ;;  %351 = vst [vmem:[%s1026_s3 + $0x18] sm:$0xff] %v287_v36  ;;  %v444_v46 = vunpack.c.l.bf16 %v551_v34  ;;  %v445_v47 = vunpack.c.h.bf16 %v551_v34  ;;  %v448_v50 = vunpack.c.l.bf16 %v552_v39  ;;  %v449_v51 = vunpack.c.h.bf16 %v552_v39 }
   0xc   :  { %352 = vst [vmem:[%s1026_s3 + $0x20] sm:$0xff] %v288_v37  ;;  %353 = vst [vmem:[%s1026_s3 + $0x28] sm:$0xff] %v289_v38  ;;  %v157_v48 = vmul.f32 %v436_v42, %v603_v1  ;;  %v158_v49 = vmul.f32 %v437_v43, %v603_v1  ;;  %v159_v52 = vmul.f32 %v440_v44, %v603_v1  ;;  %v452_v16 = vunpack.c.l.bf16 %v553_v0  ;;  %v557_v38 = vld [vmem:[%s1023_s0 + $0x60] sm:$0xff]   ;;  %v558_v43 = vld [vmem:[%s1023_s0 + $0x68] sm:$0xff]  }
   0xd   :  { %354 = vst [vmem:[%s1026_s3 + $0x30] sm:$0xff] %v290_v40  ;;  %355 = vst [vmem:[%s1026_s3 + $0x38] sm:$0xff] %v291_v41  ;;  %v160_v53 = vmul.f32 %v441_v45, %v603_v1  ;;  %v161_v54 = vmul.f32 %v444_v46, %v603_v1  ;;  %v162_v55 = vmul.f32 %v445_v47, %v603_v1  ;;  %v453_v17 = vunpack.c.h.bf16 %v553_v0  ;;  %v559_v44 = vld [vmem:[%s1023_s0 + $0x70] sm:$0xff]  }
   0xe   :  { %v228_v56 = vadd.f32 %v617_v7, %v157_v48  ;;  %v229_v57 = vadd.f32 %v617_v7, %v158_v49  ;;  %v163_v58 = vmul.f32 %v448_v50, %v603_v1  ;;  %v164_v59 = vmul.f32 %v449_v51, %v603_v1  ;;  %v560_v49 = vld [vmem:[%s1023_s0 + $0x78] sm:$0xff]  }
   0xf   :  { %v230_v60 = vadd.f32 %v617_v7, %v159_v52  ;;  %v231_v61 = vadd.f32 %v617_v7, %v160_v53  ;;  %v232_v62 = vadd.f32 %v617_v7, %v161_v54  ;;  %v233_v63 = vadd.f32 %v617_v7, %v162_v55 }
  0x10   :  { %v292_v2 = vmax.f32 %v228_v56, 0.0  ;;  %v293_v3 = vmax.f32 %v229_v57, 0.0  ;;  %v234_v4 = vadd.f32 %v617_v7, %v163_v58  ;;  %v235_v5 = vadd.f32 %v617_v7, %v164_v59 }
  0x11   :  { %v294_v9 = vmax.f32 %v230_v60, 0.0  ;;  %v295_v10 = vmax.f32 %v231_v61, 0.0  ;;  %v296_v11 = vmax.f32 %v232_v62, 0.0  ;;  %v297_v12 = vmax.f32 %v233_v63, 0.0 }
  0x12   :  { %356 = vst [vmem:[%s1026_s3 + $0x40] sm:$0xff] %v292_v2  ;;  %357 = vst [vmem:[%s1026_s3 + $0x48] sm:$0xff] %v293_v3  ;;  %v298_v14 = vmax.f32 %v234_v4, 0.0  ;;  %v299_v15 = vmax.f32 %v235_v5, 0.0  ;;  %v456_v18 = vunpack.c.l.bf16 %v554_v6  ;;  %v457_v19 = vunpack.c.h.bf16 %v554_v6 }
  0x13   :  { %358 = vst [vmem:[%s1026_s3 + $0x50] sm:$0xff] %v294_v9  ;;  %359 = vst [vmem:[%s1026_s3 + $0x58] sm:$0xff] %v295_v10  ;;  %v460_v20 = vunpack.c.l.bf16 %v555_v8  ;;  %v461_v21 = vunpack.c.h.bf16 %v555_v8  ;;  %v165_v22 = vmul.f32 %v452_v16, %v603_v1  ;;  %v166_v23 = vmul.f32 %v453_v17, %v603_v1  ;;  %v562_v17 = vld [vmem:[%s1023_s0 + $0x88] sm:$0xff]  }
  0x14   :  { %360 = vst [vmem:[%s1026_s3 + $0x60] sm:$0xff] %v296_v11  ;;  %361 = vst [vmem:[%s1026_s3 + $0x68] sm:$0xff] %v297_v12  ;;  %v464_v24 = vunpack.c.l.bf16 %v556_v13  ;;  %v465_v25 = vunpack.c.h.bf16 %v556_v13  ;;  %v167_v26 = vmul.f32 %v456_v18, %v603_v1  ;;  %v168_v27 = vmul.f32 %v457_v19, %v603_v1  ;;  %v561_v12 = vld [vmem:[%s1023_s0 + $0x80] sm:$0xff]   ;;  %v563_v18 = vld [vmem:[%s1023_s0 + $0x90] sm:$0xff]  }
  0x15   :  { %362 = vst [vmem:[%s1026_s3 + $0x70] sm:$0xff] %v298_v14  ;;  %363 = vst [vmem:[%s1026_s3 + $0x78] sm:$0xff] %v299_v15  ;;  %v169_v28 = vmul.f32 %v460_v20, %v603_v1  ;;  %v170_v29 = vmul.f32 %v461_v21, %v603_v1  ;;  %v236_v30 = vadd.f32 %v617_v7, %v165_v22  ;;  %v468_v52 = vunpack.c.l.bf16 %v557_v38 }
  0x16   :  { %v237_v31 = vadd.f32 %v617_v7, %v166_v23  ;;  %v171_v32 = vmul.f32 %v464_v24, %v603_v1  ;;  %v172_v33 = vmul.f32 %v465_v25, %v603_v1  ;;  %v238_v34 = vadd.f32 %v617_v7, %v167_v26  ;;  %v564_v23 = vld [vmem:[%s1023_s0 + $0x98] sm:$0xff]  }
  0x17   :  { %v239_v35 = vadd.f32 %v617_v7, %v168_v27  ;;  %v240_v36 = vadd.f32 %v617_v7, %v169_v28  ;;  %v241_v37 = vadd.f32 %v617_v7, %v170_v29  ;;  %v300_v39 = vmax.f32 %v236_v30, 0.0 }
  0x18   :  { %v301_v40 = vmax.f32 %v237_v31, 0.0  ;;  %v242_v41 = vadd.f32 %v617_v7, %v171_v32  ;;  %v243_v42 = vadd.f32 %v617_v7, %v172_v33  ;;  %v302_v45 = vmax.f32 %v238_v34, 0.0 }
  0x19   :  { %v303_v46 = vmax.f32 %v239_v35, 0.0  ;;  %v304_v47 = vmax.f32 %v240_v36, 0.0  ;;  %v305_v48 = vmax.f32 %v241_v37, 0.0  ;;  %364 = vst [vmem:[%s1026_s3 + $0x80] sm:$0xff] %v300_v39  ;;  %v469_v53 = vunpack.c.h.bf16 %v557_v38 }
  0x1a   :  { %365 = vst [vmem:[%s1026_s3 + $0x88] sm:$0xff] %v301_v40  ;;  %v306_v50 = vmax.f32 %v242_v41, 0.0  ;;  %v307_v51 = vmax.f32 %v243_v42, 0.0  ;;  %366 = vst [vmem:[%s1026_s3 + $0x90] sm:$0xff] %v302_v45  ;;  %v472_v54 = vunpack.c.l.bf16 %v558_v43  ;;  %v473_v55 = vunpack.c.h.bf16 %v558_v43 }
  0x1b   :  { %367 = vst [vmem:[%s1026_s3 + $0x98] sm:$0xff] %v303_v46  ;;  %368 = vst [vmem:[%s1026_s3 + $0xa0] sm:$0xff] %v304_v47  ;;  %v476_v56 = vunpack.c.l.bf16 %v559_v44  ;;  %v477_v57 = vunpack.c.h.bf16 %v559_v44  ;;  %v173_v58 = vmul.f32 %v468_v52, %v603_v1  ;;  %v174_v59 = vmul.f32 %v469_v53, %v603_v1  ;;  %v566_v53 = vld [vmem:[%s1023_s0 + $0xa8] sm:$0xff]  }
  0x1c   :  { %369 = vst [vmem:[%s1026_s3 + $0xa8] sm:$0xff] %v305_v48  ;;  %370 = vst [vmem:[%s1026_s3 + $0xb0] sm:$0xff] %v306_v50  ;;  %v480_v60 = vunpack.c.l.bf16 %v560_v49  ;;  %v481_v61 = vunpack.c.h.bf16 %v560_v49  ;;  %v175_v62 = vmul.f32 %v472_v54, %v603_v1  ;;  %v176_v63 = vmul.f32 %v473_v55, %v603_v1  ;;  %v565_v48 = vld [vmem:[%s1023_s0 + $0xa0] sm:$0xff]   ;;  %v567_v54 = vld [vmem:[%s1023_s0 + $0xb0] sm:$0xff]  }
  0x1d   :  { %371 = vst [vmem:[%s1026_s3 + $0xb8] sm:$0xff] %v307_v51  ;;  %v177_v0 = vmul.f32 %v476_v56, %v603_v1  ;;  %v178_v2 = vmul.f32 %v477_v57, %v603_v1  ;;  %v244_v3 = vadd.f32 %v617_v7, %v173_v58  ;;  %v245_v4 = vadd.f32 %v617_v7, %v174_v59  ;;  %v568_v59 = vld [vmem:[%s1023_s0 + $0xb8] sm:$0xff]  }
  0x1e   :  { %v179_v5 = vmul.f32 %v480_v60, %v603_v1  ;;  %v180_v6 = vmul.f32 %v481_v61, %v603_v1  ;;  %v246_v8 = vadd.f32 %v617_v7, %v175_v62  ;;  %v247_v9 = vadd.f32 %v617_v7, %v176_v63 }
  0x1f   :  { %v248_v10 = vadd.f32 %v617_v7, %v177_v0  ;;  %v249_v11 = vadd.f32 %v617_v7, %v178_v2  ;;  %v308_v13 = vmax.f32 %v244_v3, 0.0  ;;  %v309_v14 = vmax.f32 %v245_v4, 0.0 }
  0x20   :  { %v250_v15 = vadd.f32 %v617_v7, %v179_v5  ;;  %v251_v16 = vadd.f32 %v617_v7, %v180_v6  ;;  %v310_v19 = vmax.f32 %v246_v8, 0.0  ;;  %v311_v20 = vmax.f32 %v247_v9, 0.0 }
  0x21   :  { %v312_v21 = vmax.f32 %v248_v10, 0.0  ;;  %v313_v22 = vmax.f32 %v249_v11, 0.0  ;;  %372 = vst [vmem:[%s1026_s3 + $0xc0] sm:$0xff] %v308_v13  ;;  %373 = vst [vmem:[%s1026_s3 + $0xc8] sm:$0xff] %v309_v14  ;;  %v484_v26 = vunpack.c.l.bf16 %v561_v12  ;;  %v485_v27 = vunpack.c.h.bf16 %v561_v12 }
  0x22   :  { %v314_v24 = vmax.f32 %v250_v15, 0.0  ;;  %v315_v25 = vmax.f32 %v251_v16, 0.0  ;;  %374 = vst [vmem:[%s1026_s3 + $0xd0] sm:$0xff] %v310_v19  ;;  %375 = vst [vmem:[%s1026_s3 + $0xd8] sm:$0xff] %v311_v20  ;;  %v488_v28 = vunpack.c.l.bf16 %v562_v17  ;;  %v489_v29 = vunpack.c.h.bf16 %v562_v17 }
  0x23   :  { %376 = vst [vmem:[%s1026_s3 + $0xe0] sm:$0xff] %v312_v21  ;;  %377 = vst [vmem:[%s1026_s3 + $0xe8] sm:$0xff] %v313_v22  ;;  %v492_v30 = vunpack.c.l.bf16 %v563_v18  ;;  %v493_v31 = vunpack.c.h.bf16 %v563_v18  ;;  %v181_v32 = vmul.f32 %v484_v26, %v603_v1  ;;  %v182_v33 = vmul.f32 %v485_v27, %v603_v1  ;;  %v569_v22 = vld [vmem:[%s1023_s0 + $0xc0] sm:$0xff]   ;;  %v570_v27 = vld [vmem:[%s1023_s0 + $0xc8] sm:$0xff]  }
  0x24   :  { %378 = vst [vmem:[%s1026_s3 + $0xf0] sm:$0xff] %v314_v24  ;;  %379 = vst [vmem:[%s1026_s3 + $0xf8] sm:$0xff] %v315_v25  ;;  %v496_v34 = vunpack.c.l.bf16 %v564_v23  ;;  %v497_v35 = vunpack.c.h.bf16 %v564_v23  ;;  %v183_v36 = vmul.f32 %v488_v28, %v603_v1  ;;  %v184_v37 = vmul.f32 %v489_v29, %v603_v1  ;;  %v571_v28 = vld [vmem:[%s1023_s0 + $0xd0] sm:$0xff]  }
  0x25   :  { %v185_v38 = vmul.f32 %v492_v30, %v603_v1  ;;  %v186_v39 = vmul.f32 %v493_v31, %v603_v1  ;;  %v252_v40 = vadd.f32 %v617_v7, %v181_v32  ;;  %v253_v41 = vadd.f32 %v617_v7, %v182_v33  ;;  %v572_v33 = vld [vmem:[%s1023_s0 + $0xd8] sm:$0xff]  }
  0x26   :  { %v187_v42 = vmul.f32 %v496_v34, %v603_v1  ;;  %v188_v43 = vmul.f32 %v497_v35, %v603_v1  ;;  %v254_v44 = vadd.f32 %v617_v7, %v183_v36  ;;  %v255_v45 = vadd.f32 %v617_v7, %v184_v37 }
  0x27   :  { %v256_v46 = vadd.f32 %v617_v7, %v185_v38  ;;  %v257_v47 = vadd.f32 %v617_v7, %v186_v39  ;;  %v316_v49 = vmax.f32 %v252_v40, 0.0  ;;  %v317_v50 = vmax.f32 %v253_v41, 0.0 }
  0x28   :  { %v258_v51 = vadd.f32 %v617_v7, %v187_v42  ;;  %v259_v52 = vadd.f32 %v617_v7, %v188_v43  ;;  %v318_v55 = vmax.f32 %v254_v44, 0.0  ;;  %v319_v56 = vmax.f32 %v255_v45, 0.0 }
  0x29   :  { %v320_v57 = vmax.f32 %v256_v46, 0.0  ;;  %v321_v58 = vmax.f32 %v257_v47, 0.0  ;;  %380 = vst [vmem:[%s1026_s3 + $0x100] sm:$0xff] %v316_v49  ;;  %381 = vst [vmem:[%s1026_s3 + $0x108] sm:$0xff] %v317_v50  ;;  %v500_v62 = vunpack.c.l.bf16 %v565_v48  ;;  %v501_v63 = vunpack.c.h.bf16 %v565_v48 }
  0x2a   :  { %v322_v60 = vmax.f32 %v258_v51, 0.0  ;;  %v323_v61 = vmax.f32 %v259_v52, 0.0  ;;  %382 = vst [vmem:[%s1026_s3 + $0x110] sm:$0xff] %v318_v55  ;;  %383 = vst [vmem:[%s1026_s3 + $0x118] sm:$0xff] %v319_v56  ;;  %v504_v0 = vunpack.c.l.bf16 %v566_v53  ;;  %v505_v2 = vunpack.c.h.bf16 %v566_v53 }
  0x2b   :  { %384 = vst [vmem:[%s1026_s3 + $0x120] sm:$0xff] %v320_v57  ;;  %385 = vst [vmem:[%s1026_s3 + $0x128] sm:$0xff] %v321_v58  ;;  %v508_v3 = vunpack.c.l.bf16 %v567_v54  ;;  %v509_v4 = vunpack.c.h.bf16 %v567_v54  ;;  %v189_v5 = vmul.f32 %v500_v62, %v603_v1  ;;  %v190_v6 = vmul.f32 %v501_v63, %v603_v1  ;;  %v573_v58 = vld [vmem:[%s1023_s0 + $0xe0] sm:$0xff]   ;;  %v574_v63 = vld [vmem:[%s1023_s0 + $0xe8] sm:$0xff]  }
  0x2c   :  { %386 = vst [vmem:[%s1026_s3 + $0x130] sm:$0xff] %v322_v60  ;;  %387 = vst [vmem:[%s1026_s3 + $0x138] sm:$0xff] %v323_v61  ;;  %v512_v8 = vunpack.c.l.bf16 %v568_v59  ;;  %v513_v9 = vunpack.c.h.bf16 %v568_v59  ;;  %v191_v10 = vmul.f32 %v504_v0, %v603_v1  ;;  %v192_v11 = vmul.f32 %v505_v2, %v603_v1  ;;  %v575_v0 = vld [vmem:[%s1023_s0 + $0xf0] sm:$0xff]  }
  0x2d   :  { %v193_v12 = vmul.f32 %v508_v3, %v603_v1  ;;  %v194_v13 = vmul.f32 %v509_v4, %v603_v1  ;;  %v260_v14 = vadd.f32 %v617_v7, %v189_v5  ;;  %v261_v15 = vadd.f32 %v617_v7, %v190_v6  ;;  %v576_v6 = vld [vmem:[%s1023_s0 + $0xf8] sm:$0xff]  }
  0x2e   :  { %v195_v16 = vmul.f32 %v512_v8, %v603_v1  ;;  %v196_v17 = vmul.f32 %v513_v9, %v603_v1  ;;  %v262_v18 = vadd.f32 %v617_v7, %v191_v10  ;;  %v263_v19 = vadd.f32 %v617_v7, %v192_v11 }
  0x2f   :  { %v264_v20 = vadd.f32 %v617_v7, %v193_v12  ;;  %v265_v21 = vadd.f32 %v617_v7, %v194_v13  ;;  %v324_v23 = vmax.f32 %v260_v14, 0.0  ;;  %v325_v24 = vmax.f32 %v261_v15, 0.0 }
  0x30   :  { %v266_v25 = vadd.f32 %v617_v7, %v195_v16  ;;  %v267_v26 = vadd.f32 %v617_v7, %v196_v17  ;;  %v326_v29 = vmax.f32 %v262_v18, 0.0  ;;  %v327_v30 = vmax.f32 %v263_v19, 0.0 }
  0x31   :  { %v328_v31 = vmax.f32 %v264_v20, 0.0  ;;  %v329_v32 = vmax.f32 %v265_v21, 0.0  ;;  %388 = vst [vmem:[%s1026_s3 + $0x140] sm:$0xff] %v324_v23  ;;  %389 = vst [vmem:[%s1026_s3 + $0x148] sm:$0xff] %v325_v24  ;;  %v516_v36 = vunpack.c.l.bf16 %v569_v22  ;;  %v517_v37 = vunpack.c.h.bf16 %v569_v22 }
  0x32   :  { %v330_v34 = vmax.f32 %v266_v25, 0.0  ;;  %v331_v35 = vmax.f32 %v267_v26, 0.0  ;;  %390 = vst [vmem:[%s1026_s3 + $0x150] sm:$0xff] %v326_v29  ;;  %391 = vst [vmem:[%s1026_s3 + $0x158] sm:$0xff] %v327_v30  ;;  %v520_v38 = vunpack.c.l.bf16 %v570_v27  ;;  %v521_v39 = vunpack.c.h.bf16 %v570_v27 }
  0x33   :  { %392 = vst [vmem:[%s1026_s3 + $0x160] sm:$0xff] %v328_v31  ;;  %393 = vst [vmem:[%s1026_s3 + $0x168] sm:$0xff] %v329_v32  ;;  %v524_v40 = vunpack.c.l.bf16 %v571_v28  ;;  %v525_v41 = vunpack.c.h.bf16 %v571_v28  ;;  %v197_v42 = vmul.f32 %v516_v36, %v603_v1  ;;  %v198_v43 = vmul.f32 %v517_v37, %v603_v1 }
  0x34   :  { %394 = vst [vmem:[%s1026_s3 + $0x170] sm:$0xff] %v330_v34  ;;  %395 = vst [vmem:[%s1026_s3 + $0x178] sm:$0xff] %v331_v35  ;;  %v528_v44 = vunpack.c.l.bf16 %v572_v33  ;;  %v529_v45 = vunpack.c.h.bf16 %v572_v33  ;;  %v199_v46 = vmul.f32 %v520_v38, %v603_v1  ;;  %v200_v47 = vmul.f32 %v521_v39, %v603_v1 }
  0x35   :  { %v201_v48 = vmul.f32 %v524_v40, %v603_v1  ;;  %v202_v49 = vmul.f32 %v525_v41, %v603_v1  ;;  %v268_v50 = vadd.f32 %v617_v7, %v197_v42  ;;  %v269_v51 = vadd.f32 %v617_v7, %v198_v43 }
  0x36   :  { %v203_v52 = vmul.f32 %v528_v44, %v603_v1  ;;  %v204_v53 = vmul.f32 %v529_v45, %v603_v1  ;;  %v270_v54 = vadd.f32 %v617_v7, %v199_v46  ;;  %v271_v55 = vadd.f32 %v617_v7, %v200_v47 }
  0x37   :  { %v272_v56 = vadd.f32 %v617_v7, %v201_v48  ;;  %v273_v57 = vadd.f32 %v617_v7, %v202_v49  ;;  %v332_v59 = vmax.f32 %v268_v50, 0.0  ;;  %v333_v60 = vmax.f32 %v269_v51, 0.0 }
  0x38   :  { %v274_v61 = vadd.f32 %v617_v7, %v203_v52  ;;  %v275_v62 = vadd.f32 %v617_v7, %v204_v53  ;;  %v334_v2 = vmax.f32 %v270_v54, 0.0  ;;  %v335_v3 = vmax.f32 %v271_v55, 0.0 }
  0x39   :  { %v336_v4 = vmax.f32 %v272_v56, 0.0  ;;  %v337_v5 = vmax.f32 %v273_v57, 0.0  ;;  %396 = vst [vmem:[%s1026_s3 + $0x180] sm:$0xff] %v332_v59  ;;  %397 = vst [vmem:[%s1026_s3 + $0x188] sm:$0xff] %v333_v60  ;;  %v532_v10 = vunpack.c.l.bf16 %v573_v58  ;;  %v533_v11 = vunpack.c.h.bf16 %v573_v58 }
  0x3a   :  { %v338_v8 = vmax.f32 %v274_v61, 0.0  ;;  %v339_v9 = vmax.f32 %v275_v62, 0.0  ;;  %398 = vst [vmem:[%s1026_s3 + $0x190] sm:$0xff] %v334_v2  ;;  %399 = vst [vmem:[%s1026_s3 + $0x198] sm:$0xff] %v335_v3  ;;  %v536_v12 = vunpack.c.l.bf16 %v574_v63  ;;  %v537_v13 = vunpack.c.h.bf16 %v574_v63 }
  0x3b   :  { %400 = vst [vmem:[%s1026_s3 + $0x1a0] sm:$0xff] %v336_v4  ;;  %401 = vst [vmem:[%s1026_s3 + $0x1a8] sm:$0xff] %v337_v5  ;;  %v540_v14 = vunpack.c.l.bf16 %v575_v0  ;;  %v541_v15 = vunpack.c.h.bf16 %v575_v0  ;;  %v205_v16 = vmul.f32 %v532_v10, %v603_v1  ;;  %v206_v17 = vmul.f32 %v533_v11, %v603_v1 }
  0x3c   :  { %402 = vst [vmem:[%s1026_s3 + $0x1b0] sm:$0xff] %v338_v8  ;;  %403 = vst [vmem:[%s1026_s3 + $0x1b8] sm:$0xff] %v339_v9  ;;  %v544_v18 = vunpack.c.l.bf16 %v576_v6  ;;  %v545_v19 = vunpack.c.h.bf16 %v576_v6  ;;  %v207_v20 = vmul.f32 %v536_v12, %v603_v1  ;;  %v208_v21 = vmul.f32 %v537_v13, %v603_v1 }
  0x3d   :  { %v209_v22 = vmul.f32 %v540_v14, %v603_v1  ;;  %v210_v23 = vmul.f32 %v541_v15, %v603_v1  ;;  %v276_v24 = vadd.f32 %v617_v7, %v205_v16  ;;  %v277_v25 = vadd.f32 %v617_v7, %v206_v17 }
  0x3e   :  { %v211_v26 = vmul.f32 %v544_v18, %v603_v1  ;;  %v212_v27 = vmul.f32 %v545_v19, %v603_v1  ;;  %v278_v28 = vadd.f32 %v617_v7, %v207_v20  ;;  %v279_v29 = vadd.f32 %v617_v7, %v208_v21 }
  0x3f   :  { %v280_v30 = vadd.f32 %v617_v7, %v209_v22  ;;  %v281_v31 = vadd.f32 %v617_v7, %v210_v23  ;;  %v340_v32 = vmax.f32 %v276_v24, 0.0  ;;  %v341_v33 = vmax.f32 %v277_v25, 0.0 }
  0x40   :  { %v282_v34 = vadd.f32 %v617_v7, %v211_v26  ;;  %v283_v35 = vadd.f32 %v617_v7, %v212_v27  ;;  %v342_v36 = vmax.f32 %v278_v28, 0.0  ;;  %v343_v37 = vmax.f32 %v279_v29, 0.0 }
  0x41   :  { %v344_v38 = vmax.f32 %v280_v30, 0.0  ;;  %v345_v39 = vmax.f32 %v281_v31, 0.0  ;;  %404 = vst [vmem:[%s1026_s3 + $0x1c0] sm:$0xff] %v340_v32  ;;  %405 = vst [vmem:[%s1026_s3 + $0x1c8] sm:$0xff] %v341_v33 }
  0x42   :  { %v346_v1 = vmax.f32 %v282_v34, 0.0  ;;  %v347_v40 = vmax.f32 %v283_v35, 0.0  ;;  %406 = vst [vmem:[%s1026_s3 + $0x1d0] sm:$0xff] %v342_v36  ;;  %407 = vst [vmem:[%s1026_s3 + $0x1d8] sm:$0xff] %v343_v37 }
  0x43   :  { %408 = vst [vmem:[%s1026_s3 + $0x1e0] sm:$0xff] %v344_v38  ;;  %409 = vst [vmem:[%s1026_s3 + $0x1e8] sm:$0xff] %v345_v39 }
  0x44   :  { %410 = vst [vmem:[%s1026_s3 + $0x1f0] sm:$0xff] %v346_v1  ;;  %411 = vst [vmem:[%s1026_s3 + $0x1f8] sm:$0xff] %v347_v40 }

// kernel: conv2d_layer_forward.2
= control target key start
LH: loop header
LB: loop body
LE: loop exit
PB: predicated region body
PF: predicated region fallthrough
CT: control target
= control target key end

     0   :  { %s1587_s15 = smov 0   ;;  %s1589_s16 = smov 0   ;;  %s1796_s0 = inlined_call_operand.vmem [shape: bf16[512,128], index: 0, kind: input, shape index: {}]   ;;  %s1797_s1 = inlined_call_operand.vmem [shape: bf16[128,128], index: 1, kind: input, shape index: {}]   ;;  %s1798_s2 = inlined_call_operand.vmem [shape: bf16[512,128], index: 2, kind: output, shape index: {0}]   ;;  %s1799_s3 = inlined_call_operand.vmem [shape: f32[16,128], index: 3, kind: output, shape index: {1}]   ;;  %s1800_s4 = inlined_call_operand.vmem [shape: f32[16,128], index: 4, kind: output, shape index: {2}]  }
   0x1   :  { %s1591_s17 = smov 0  }
   0x2 LB: > { %s27_s18 = sadd.s32 1, %s1555_s16  ;;  %p1208_p0 = scmp.ge.s32.totalorder %s1559_s17, 1  ;;  %s1559_s17 = sphi %s1591_s17, %s15_s17   ;;  %s1555_s16 = sphi %s1589_s16, %s1802_s16   ;;  %s1551_s15 = sphi %s1587_s15, %s1801_s15  }
   0x3   : > { %p29_p1 = scmp.ge.s32.totalorder %s27_s18, 2  ;;  %p196_p2 = scmp.lt.s32.totalorder %s1559_s17, 3 }
   0x5   : > { %s1804_s18 = smov (%p29_p1, %s27_s18), 0  ;;  %p197_p3 = pnand %p1208_p0, %p196_p2 }
   0x6   : > { %s1209_s21 = sshll.u32 (!%p197_p3), %s1551_s15, 5  ;;  %p259_p5 = scmp.lt.s32.totalorder (!%p197_p3), %s1551_s15, 1 }
   0x7   : > { %200 = sbr.rel (%p197_p3) target bundleno = 321 (0x141), region = 28  ;;  %p239_p4 = scmp.lt.s32.totalorder (!%p197_p3), %s1209_s21, 63 }
   0xc   : > { %v1513_v0 = vld [vmem:[%s1797_s1 + $0x38] sm:$0xff]   ;;  %v1514_v1 = vld [vmem:[%s1797_s1 + $0x30] sm:$0xff]   ;;  %s1806_s21 = smov (!%p239_p4, %s1209_s21), 63  ;;  %v1515_v2 = vld [vmem:[%s1797_s1 + $0x28] sm:$0xff]   ;;  %s1808_s15 = smov (!%p259_p5, %s1551_s15), 1  ;;  %v1561_v24 = vmov 0.0  }
   0xd   : > { %1424 = vmatprep.subr.bf16.mxu0 %v1513_v0  ;;  %1472 = vmatprep.subr.bf16.mxu1 %v1513_v0  ;;  %s1210_s26 = sshll.u32 %s1806_s21, 2  ;;  %v1516_v3 = vld [vmem:[%s1797_s1 + $0x20] sm:$0xff]   ;;  %v1517_v5 = vld [vmem:[%s1797_s1 + $0x18] sm:$0xff]   ;;  %v1518_v6 = vld [vmem:[%s1797_s1 + $0x10] sm:$0xff]   ;;  %s1213_s14 = sshll.u32 %s1808_s15, 3 }
   0xe   : > { %1425 = vmatpush3.bf16.msra.mxu0 %v1513_v0  ;;  %1480 = vmatpush3.bf16.msra.mxu1 %v1513_v0  ;;  %s1625_s29 = scalar_lea.vmem %s1796_s0, %s1210_s26  ;;  %v1519_v8 = vld [vmem:[%s1797_s1 + $0x8] sm:$0xff]   ;;  %v1520_v9 = vld [vmem:[%s1797_s1] sm:$0xff]   ;;  %s1663_s22 = scalar_lea.vmem %s1799_s3, %s1213_s14 }
   0xf   : > { %1426 = vmatprep.subr.bf16.mxu0 %v1514_v1  ;;  %1473 = vmatprep.subr.bf16.mxu1 %v1514_v1  ;;  %v1521_v4 = vld [vmem:[%s1625_s29] sm:$0xff]   ;;  %v1522_v10 = vld [vmem:[%s1625_s29 + $0x8] sm:$0xff]   ;;  %v1523_v12 = vld [vmem:[%s1625_s29 + $0x10] sm:$0xff]   ;;  %s1668_s25 = scalar_lea.vmem %s1800_s4, %s1213_s14  ;;  %948 = vst [vmem:[%s1663_s22] sm:$0xff] %v1561_v24  ;;  %s1681_s28 = scalar_lea.vmem %s1798_s2, %s1210_s26 }
  0x10   : > { %1440 = vmatprep.mubr.bf16.mxu0 %v1521_v4  ;;  %v1529_v7 = vld [vmem:[%s1625_s29 + $0x40] sm:$0xff]   ;;  %v1530_v11 = vld [vmem:[%s1625_s29 + $0x48] sm:$0xff]   ;;  %v1531_v13 = vld [vmem:[%s1625_s29 + $0x50] sm:$0xff]   ;;  %949 = vst [vmem:[%s1668_s25] sm:$0xff] %v1561_v24 }
  0x11   : > { %1456 = vmatprep.mubr.bf16.mxu1 %v1529_v7  ;;  %v1524_v14 = vld [vmem:[%s1625_s29 + $0x18] sm:$0xff]   ;;  %v1525_v16 = vld [vmem:[%s1625_s29 + $0x20] sm:$0xff]   ;;  %v1526_v18 = vld [vmem:[%s1625_s29 + $0x28] sm:$0xff]  }
  0x12   : > { %1427 = vmatpush3.bf16.msra.mxu0 %v1514_v1  ;;  %1481 = vmatpush3.bf16.msra.mxu1 %v1514_v1  ;;  %v1532_v15 = vld [vmem:[%s1625_s29 + $0x58] sm:$0xff]   ;;  %v1533_v17 = vld [vmem:[%s1625_s29 + $0x60] sm:$0xff]   ;;  %v1534_v19 = vld [vmem:[%s1625_s29 + $0x68] sm:$0xff]  }
  0x13   : > { %1428 = vmatprep.subr.bf16.mxu0 %v1515_v2  ;;  %1474 = vmatprep.subr.bf16.mxu1 %v1515_v2  ;;  %v1527_v20 = vld [vmem:[%s1625_s29 + $0x30] sm:$0xff]   ;;  %v1528_v22 = vld [vmem:[%s1625_s29 + $0x38] sm:$0xff]  }
  0x14   : > { %v1535_v21 = vld [vmem:[%s1625_s29 + $0x70] sm:$0xff]   ;;  %v1536_v23 = vld [vmem:[%s1625_s29 + $0x78] sm:$0xff]  }
  0x16   : > { %1429 = vmatpush3.bf16.msra.mxu0 %v1515_v2  ;;  %1482 = vmatpush3.bf16.msra.mxu1 %v1515_v2 }
  0x17   : > { %1430 = vmatprep.subr.bf16.mxu0 %v1516_v3  ;;  %1475 = vmatprep.subr.bf16.mxu1 %v1516_v3 }
  0x1a   : > { %1431 = vmatpush3.bf16.msra.mxu0 %v1516_v3  ;;  %1483 = vmatpush3.bf16.msra.mxu1 %v1516_v3 }
  0x1b   : > { %1432 = vmatprep.subr.bf16.mxu0 %v1517_v5  ;;  %1476 = vmatprep.subr.bf16.mxu1 %v1517_v5 }
  0x1e   : > { %1433 = vmatpush3.bf16.msra.mxu0 %v1517_v5  ;;  %1484 = vmatpush3.bf16.msra.mxu1 %v1517_v5 }
  0x1f   : > { %1434 = vmatprep.subr.bf16.mxu0 %v1518_v6  ;;  %1477 = vmatprep.subr.bf16.mxu1 %v1518_v6 }
  0x22   : > { %1435 = vmatpush3.bf16.msra.mxu0 %v1518_v6  ;;  %1485 = vmatpush3.bf16.msra.mxu1 %v1518_v6 }
  0x23   : > { %1436 = vmatprep.subr.bf16.mxu0 %v1519_v8  ;;  %1478 = vmatprep.subr.bf16.mxu1 %v1519_v8 }
  0x26   : > { %1437 = vmatpush3.bf16.msra.mxu0 %v1519_v8  ;;  %1486 = vmatpush3.bf16.msra.mxu1 %v1519_v8 }
  0x27   : > { %1438 = vmatprep.subr.bf16.mxu0 %v1520_v9  ;;  %1479 = vmatprep.subr.bf16.mxu1 %v1520_v9 }
  0x2a   : > { %1439 = vmatpush3.bf16.msra.mxu0 %v1520_v9  ;;  %1487 = vmatpush3.bf16.msra.mxu1 %v1520_v9 }
  0x2d   : > { %1441 = vmatmul.mubr.bf16.vlgmr.msra.gmra.mxu0 %v1522_v10  ;;  %1457 = vmatmul.mubr.bf16.vlgmr.msra.gmra.mxu1 %v1530_v11 }
  0x2e   : > { %1444 = vmatprep.mubr.bf16.mxu0 %v1523_v12  ;;  %1460 = vmatprep.mubr.bf16.mxu1 %v1531_v13 }
  0x35   : > { %1445 = vmatmul.mubr.bf16.gmra.mxu0 %v1524_v14  ;;  %1461 = vmatmul.mubr.bf16.gmra.mxu1 %v1532_v15 }
  0x36   : > { %1448 = vmatprep.mubr.bf16.mxu0 %v1525_v16  ;;  %1464 = vmatprep.mubr.bf16.mxu1 %v1533_v17 }
  0x3d   : > { %1449 = vmatmul.mubr.bf16.gmra.mxu0 %v1526_v18  ;;  %1465 = vmatmul.mubr.bf16.gmra.mxu1 %v1534_v19 }
  0x3e   : > { %1452 = vmatprep.mubr.bf16.mxu0 %v1527_v20  ;;  %1468 = vmatprep.mubr.bf16.mxu1 %v1535_v21 }
  0x45   : > { %1453 = vmatmul.mubr.bf16.gmra.mxu0 %v1528_v22  ;;  %1469 = vmatmul.mubr.bf16.gmra.mxu1 %v1536_v23 }
  0xed   : > { %v1442_v25 = vpop.f32.mrf.mxu0  ;;  %v1672_v26 = vpop.f32.mrf.mxu1 }
  0xee   : > { %v990_v42 = vmul.f32 %v1442_v25, %v1442_v25 }
  0xef   : > { %v562_v27 = vpop.f32.mrf.mxu0  ;;  %v1674_v28 = vpop.f32.mrf.mxu1 }
  0xf0   : > { %v988_v33 = vmul.f32 %v562_v27, %v562_v27 }
  0xf1   : > { %v1443_v29 = vpop.f32.mrf.mxu0  ;;  %v1683_v30 = vpop.f32.mrf.mxu1 }
  0xf2   : > { %v1313_v31 = vpack.c.bf16 %v1443_v29, %v1442_v25  ;;  %v1353_v32 = vpack.c.bf16 %v1683_v30, %v1672_v26  ;;  %v991_v47 = vmul.f32 %v1443_v29, %v1443_v29 }
  0xf3   : > { %v565_v34 = vpop.f32.mrf.mxu0  ;;  %v1687_v35 = vpop.f32.mrf.mxu1 }
  0xf4   : > { %1385 = vst [vmem:[%s1681_s28 + $0x8] sm:$0xff] %v1313_v31   ;;  %v1308_v36 = vpack.c.bf16 %v565_v34, %v562_v27  ;;  %v950_v37 = vadd.f32 %v565_v34, %v562_v27  ;;  %v989_v38 = vmul.f32 %v565_v34, %v565_v34  ;;  %1393 = vst [vmem:[%s1681_s28 + $0x48] sm:$0xff] %v1353_v32  }
  0xf5   : > { %v1348_v39 = vpack.c.bf16 %v1687_v35, %v1674_v28  ;;  %v1446_v40 = vpop.f32.mrf.mxu0  ;;  %v1693_v41 = vpop.f32.mrf.mxu1 }
  0xf6   : > { %1309 = vst [vmem:[%s1681_s28] sm:$0xff] %v1308_v36   ;;  %v951_v43 = vadd.f32 %v1442_v25, %v950_v37  ;;  %v1020_v44 = vadd.f32 %v989_v38, %v988_v33  ;;  %v994_v2 = vmul.f32 %v1446_v40, %v1446_v40 }
  0xf7   : > { %1392 = vst [vmem:[%s1681_s28 + $0x40] sm:$0xff] %v1348_v39   ;;  %v578_v45 = vpop.f32.mrf.mxu0  ;;  %v1697_v46 = vpop.f32.mrf.mxu1 }
  0xf8   : > { %v1021_v48 = vadd.f32 %v1020_v44, %v990_v42  ;;  %v952_v49 = vadd.f32 %v1443_v29, %v951_v43  ;;  %v992_v53 = vmul.f32 %v578_v45, %v578_v45 }
  0xf9   : > { %v1447_v50 = vpop.f32.mrf.mxu0  ;;  %v1699_v51 = vpop.f32.mrf.mxu1 }
  0xfa   : > { %v953_v52 = vadd.f32 %v952_v49, %v578_v45  ;;  %v1022_v54 = vadd.f32 %v1021_v48, %v991_v47  ;;  %v1323_v55 = vpack.c.bf16 %v1447_v50, %v1446_v40  ;;  %v1363_v57 = vpack.c.bf16 %v1699_v51, %v1693_v41 }
  0xfb   : > { %v581_v56 = vpop.f32.mrf.mxu0  ;;  %v1703_v58 = vpop.f32.mrf.mxu1  ;;  %v995_v7 = vmul.f32 %v1447_v50, %v1447_v50 }
  0xfc   : > { %v1023_v59 = vadd.f32 %v1022_v54, %v992_v53  ;;  %1387 = vst [vmem:[%s1681_s28 + $0x18] sm:$0xff] %v1323_v55   ;;  %v1318_v60 = vpack.c.bf16 %v581_v56, %v578_v45  ;;  %v954_v61 = vadd.f32 %v953_v52, %v581_v56  ;;  %v993_v62 = vmul.f32 %v581_v56, %v581_v56 }
  0xfd   : > { %v1450_v63 = vpop.f32.mrf.mxu0  ;;  %1395 = vst [vmem:[%s1681_s28 + $0x58] sm:$0xff] %v1363_v57   ;;  %v1358_v0 = vpack.c.bf16 %v1703_v58, %v1697_v46  ;;  %v1709_v1 = vpop.f32.mrf.mxu1 }
  0xfe   : > { %1386 = vst [vmem:[%s1681_s28 + $0x10] sm:$0xff] %v1318_v60   ;;  %v955_v3 = vadd.f32 %v1446_v40, %v954_v61  ;;  %v1024_v4 = vadd.f32 %v1023_v59, %v993_v62  ;;  %v998_v27 = vmul.f32 %v1450_v63, %v1450_v63  ;;  %v1004_v62 = vmul.f32 %v1674_v28, %v1674_v28 }
  0xff   : > { %v594_v5 = vpop.f32.mrf.mxu0  ;;  %1394 = vst [vmem:[%s1681_s28 + $0x50] sm:$0xff] %v1358_v0   ;;  %v1713_v6 = vpop.f32.mrf.mxu1 }
 0x100   : > { %v1025_v8 = vadd.f32 %v1024_v4, %v994_v2  ;;  %v956_v9 = vadd.f32 %v1447_v50, %v955_v3  ;;  %v996_v13 = vmul.f32 %v594_v5, %v594_v5  ;;  %v1005_v3 = vmul.f32 %v1687_v35, %v1687_v35 }
 0x101   : > { %v1451_v10 = vpop.f32.mrf.mxu0  ;;  %v1715_v11 = vpop.f32.mrf.mxu1 }
 0x102   : > { %v957_v12 = vadd.f32 %v956_v9, %v594_v5  ;;  %v1026_v14 = vadd.f32 %v1025_v8, %v995_v7  ;;  %v1333_v15 = vpack.c.bf16 %v1451_v10, %v1450_v63  ;;  %v1373_v17 = vpack.c.bf16 %v1715_v11, %v1709_v1 }
 0x103   : > { %v597_v16 = vpop.f32.mrf.mxu0  ;;  %v1719_v18 = vpop.f32.mrf.mxu1  ;;  %v999_v34 = vmul.f32 %v1451_v10, %v1451_v10  ;;  %v1007_v9 = vmul.f32 %v1683_v30, %v1683_v30 }
 0x104   : > { %v1027_v19 = vadd.f32 %v1026_v14, %v996_v13  ;;  %1389 = vst [vmem:[%s1681_s28 + $0x28] sm:$0xff] %v1333_v15   ;;  %v1328_v20 = vpack.c.bf16 %v597_v16, %v594_v5  ;;  %v958_v21 = vadd.f32 %v957_v12, %v597_v16  ;;  %v997_v22 = vmul.f32 %v597_v16, %v597_v16 }
 0x105   : > { %v1454_v23 = vpop.f32.mrf.mxu0  ;;  %1397 = vst [vmem:[%s1681_s28 + $0x68] sm:$0xff] %v1373_v17   ;;  %v1368_v24 = vpack.c.bf16 %v1719_v18, %v1713_v6  ;;  %v1725_v25 = vpop.f32.mrf.mxu1  ;;  %v1006_v5 = vmul.f32 %v1672_v26, %v1672_v26  ;;  %v1008_v13 = vmul.f32 %v1697_v46, %v1697_v46  ;;  %v1009_v16 = vmul.f32 %v1703_v58, %v1703_v58 }
 0x106   : > { %1388 = vst [vmem:[%s1681_s28 + $0x20] sm:$0xff] %v1328_v20   ;;  %v959_v29 = vadd.f32 %v1450_v63, %v958_v21  ;;  %v1028_v31 = vadd.f32 %v1027_v19, %v997_v22  ;;  %v1002_v55 = vmul.f32 %v1454_v23, %v1454_v23  ;;  %v1012_v22 = vmul.f32 %v1713_v6, %v1713_v6 }
 0x107   : > { %v610_v32 = vpop.f32.mrf.mxu0  ;;  %1396 = vst [vmem:[%s1681_s28 + $0x60] sm:$0xff] %v1368_v24   ;;  %v1729_v33 = vpop.f32.mrf.mxu1 }
 0x108   : > { %v1029_v36 = vadd.f32 %v1028_v31, %v998_v27  ;;  %v960_v37 = vadd.f32 %v1451_v10, %v959_v29  ;;  %v1000_v42 = vmul.f32 %v610_v32, %v610_v32  ;;  %v1013_v27 = vmul.f32 %v1719_v18, %v1719_v18 }
 0x109   : > { %v1455_v38 = vpop.f32.mrf.mxu0  ;;  %v1731_v39 = vpop.f32.mrf.mxu1 }
 0x10a   : > { %v961_v40 = vadd.f32 %v960_v37, %v610_v32  ;;  %v1030_v43 = vadd.f32 %v1029_v36, %v999_v34  ;;  %v1343_v44 = vpack.c.bf16 %v1455_v38, %v1454_v23  ;;  %v1383_v47 = vpack.c.bf16 %v1731_v39, %v1725_v25 }
 0x10b   : > { %v613_v45 = vpop.f32.mrf.mxu0  ;;  %v677_v48 = vpop.f32.mrf.mxu1  ;;  %v1003_v59 = vmul.f32 %v1455_v38, %v1455_v38  ;;  %v1016_v36 = vmul.f32 %v1729_v33, %v1729_v33 }
 0x10c   : > { %v1031_v49 = vadd.f32 %v1030_v43, %v1000_v42  ;;  %1391 = vst [vmem:[%s1681_s28 + $0x38] sm:$0xff] %v1343_v44   ;;  %v1338_v50 = vpack.c.bf16 %v613_v45, %v610_v32  ;;  %v962_v52 = vadd.f32 %v961_v40, %v613_v45  ;;  %v1001_v53 = vmul.f32 %v613_v45, %v613_v45 }
 0x10d   : > { %1399 = vst [vmem:[%s1681_s28 + $0x78] sm:$0xff] %v1383_v47   ;;  %v1378_v54 = vpack.c.bf16 %v677_v48, %v1729_v33  ;;  %v1017_v40 = vmul.f32 %v677_v48, %v677_v48  ;;  %v1018_v42 = vmul.f32 %v1725_v25, %v1725_v25  ;;  %v1019_v44 = vmul.f32 %v1731_v39, %v1731_v39 }
 0x10e   : > { %1390 = vst [vmem:[%s1681_s28 + $0x30] sm:$0xff] %v1338_v50   ;;  %v963_v56 = vadd.f32 %v1454_v23, %v962_v52  ;;  %v1032_v57 = vadd.f32 %v1031_v49, %v1001_v53 }
 0x10f   : > { %1398 = vst [vmem:[%s1681_s28 + $0x70] sm:$0xff] %v1378_v54  }
 0x110   : > { %v964_v60 = vadd.f32 %v1455_v38, %v963_v56  ;;  %v1033_v61 = vadd.f32 %v1032_v57, %v1002_v55 }
 0x112   : > { %v1034_v63 = vadd.f32 %v1033_v61, %v1003_v59  ;;  %v965_v0 = vadd.f32 %v964_v60, %v1674_v28 }
 0x114   : > { %v966_v2 = vadd.f32 %v965_v0, %v1687_v35  ;;  %v1035_v4 = vadd.f32 %v1034_v63, %v1004_v62 }
 0x116   : > { %v967_v7 = vadd.f32 %v1672_v26, %v966_v2  ;;  %v1036_v8 = vadd.f32 %v1035_v4, %v1005_v3  ;;  %v1010_v26 = vmul.f32 %v1693_v41, %v1693_v41 }
 0x118   : > { %v1037_v10 = vadd.f32 %v1036_v8, %v1006_v5  ;;  %v968_v12 = vadd.f32 %v1683_v30, %v967_v7  ;;  %v1011_v30 = vmul.f32 %v1699_v51, %v1699_v51 }
 0x11a   : > { %v969_v28 = vadd.f32 %v968_v12, %v1697_v46  ;;  %v1038_v14 = vadd.f32 %v1037_v10, %v1007_v9 }
 0x11c   : > { %v1039_v35 = vadd.f32 %v1038_v14, %v1008_v13  ;;  %v970_v15 = vadd.f32 %v969_v28, %v1703_v58 }
 0x11e   : > { %v971_v17 = vadd.f32 %v1693_v41, %v970_v15  ;;  %v1040_v19 = vadd.f32 %v1039_v35, %v1009_v16  ;;  %v1014_v41 = vmul.f32 %v1709_v1, %v1709_v1 }
 0x120   : > { %v1041_v20 = vadd.f32 %v1040_v19, %v1010_v26  ;;  %v972_v21 = vadd.f32 %v1699_v51, %v971_v17  ;;  %v1015_v51 = vmul.f32 %v1715_v11, %v1715_v11 }
 0x122   : > { %v973_v46 = vadd.f32 %v972_v21, %v1713_v6  ;;  %v1042_v23 = vadd.f32 %v1041_v20, %v1011_v30 }
 0x124   : > { %v1043_v24 = vadd.f32 %v1042_v23, %v1012_v22  ;;  %v974_v58 = vadd.f32 %v973_v46, %v1719_v18 }
 0x126   : > { %v975_v29 = vadd.f32 %v1709_v1, %v974_v58  ;;  %v1044_v31 = vadd.f32 %v1043_v24, %v1013_v27 }
 0x128   : > { %v1045_v32 = vadd.f32 %v1044_v31, %v1014_v41  ;;  %v976_v34 = vadd.f32 %v1715_v11, %v975_v29 }
 0x12a   : > { %v977_v6 = vadd.f32 %v976_v34, %v1729_v33  ;;  %v1046_v37 = vadd.f32 %v1045_v32, %v1015_v51 }
 0x12c   : > { %v1047_v38 = vadd.f32 %v1046_v37, %v1016_v36  ;;  %v978_v18 = vadd.f32 %v977_v6, %v677_v48 }
 0x12e   : > { %v979_v1 = vadd.f32 %v1725_v25, %v978_v18  ;;  %v1048_v43 = vadd.f32 %v1047_v38, %v1017_v40 }
 0x130   : > { %v980_v11 = vadd.f32 %v1731_v39, %v979_v1  ;;  %v1049_v45 = vadd.f32 %v1048_v43, %v1018_v42 }
 0x132   : > { %v981_v47 = vrot.slane %v980_v11, 4  ;;  %v1050_v33 = vadd.f32 %v1049_v45, %v1019_v44 }
 0x134   : > { %v982_v49 = vadd.f32 %v981_v47, %v980_v11  ;;  %v1051_v50 = vrot.slane %v1050_v33, 4 }
 0x136   : > { %v983_v52 = vrot.slane %v982_v49, 2  ;;  %v1052_v48 = vadd.f32 %v1051_v50, %v1050_v33 }
 0x138   : > { %v984_v53 = vadd.f32 %v983_v52, %v982_v49  ;;  %v1053_v54 = vrot.slane %v1052_v48, 2 }
 0x13a   : > { %v985_v55 = vrot.slane %v984_v53, 1  ;;  %v1054_v56 = vadd.f32 %v1053_v54, %v1052_v48 }
 0x13c   : > { %v986_v25 = vadd.f32 %v985_v55, %v984_v53  ;;  %v1055_v57 = vrot.slane %v1054_v56, 1 }
 0x13e   : > { %987 = vst [vmem:[%s1663_s22] sm:$0x1] %v986_v25  ;;  %v1056_v59 = vadd.f32 %v1055_v57, %v1054_v56 }
 0x140   : > { %1057 = vst [vmem:[%s1668_s25] sm:$0x1] %v1056_v59 }
 0x141 PF: > { %s15_s17 = sadd.s32 1, %s1559_s17   ;;  %s1801_s15 = smov %s1555_s16 }
 0x142   : > { %p12_p6 = scmp.ge.s32.totalorder %s15_s17, 4   ;;  %s1802_s16 = smov %s1804_s18 }
 0x144   :  { %14 = sbr.rel (!%p12_p6) target bundleno = 2 (0x2), region = 93 }

</bundles_post_ra>
